<compile_context>
chip_gen: v7x
topology: tpu7x:2x2x1
jax: 0.10.0
libtpu: 0.0.40
codegen_flags: <defaults>
</compile_context>

<pallas_src>
import jax
import jax.numpy as jnp
from jax.experimental import pallas as pl
from jax.experimental.pallas import tpu as pltpu


def _round_up(x, m):
    return (x + m - 1) // m * m


def ver_gd_transform(repr_x, gd, gd_len, params, *, tm=128, n_parallel=2):
    """VerGDTransform.forward.

    repr_x: [N, D] f32 node representations
    gd:     [M] int   vertical-geodesic node indices
    gd_len: [G] int   per-group counts (sum(gd_len) == M assumed, not checked)
    params: {"w1": [D, 2D], "b1": [1, 2D], "w2": [2D, D], "b2": [1, D]}
    returns [G, D] f32
    """
    N, D = repr_x.shape
    M = gd.shape[0]
    G = gd_len.shape[0]
    H = params["w1"].shape[1]                    # 2*D

    D_pad = _round_up(max(D, 128), 128)
    H_pad = _round_up(max(H, 128), 128)
    N_pad = _round_up(max(N, 128), 128)
    G_pad = _round_up(max(G, 8), 8)

    # Resident-repr fast path budget, sized against v7x's smaller VMEM.
    if N_pad * D_pad * 4 > 24 * 1024 * 1024:
        # TODO(synk): manual double-buffered DMA gather for very large repr.
        raise NotImplementedError("repr too large for the VMEM-resident path")

    chunk = tm * n_parallel
    M_pad = _round_up(max(M, 1), chunk)          # bucketed -> fewer recompiles
    steps = M_pad // chunk                       # reduction steps per core

    # count_to_group_index(gd_len): e.g. [2, 3] -> [0, 0, 1, 1, 1]
    grp = jnp.repeat(jnp.arange(G, dtype=jnp.int32), gd_len,
                     total_repeat_length=M)
    # Padded entries get grp = -1: they match no group row -> contribute zero.
    grp_row = jnp.full((1, M_pad), -1, jnp.int32).at[0, :M].set(grp)
    # gd as a column so the per-tile block is (tm, 1) and broadcasts over lanes.
    gd_col = jnp.zeros((M_pad, 1), jnp.int32).at[:M, 0].set(gd.astype(jnp.int32))

    # Lane-dense zero padding (extra rows / cols contribute zeros, sliced off).
    repr_pad = jnp.zeros((N_pad, D_pad), jnp.float32).at[:N, :D].set(repr_x)
    w1_pad = jnp.zeros((D_pad, H_pad), jnp.float32).at[:D, :H].set(params["w1"])
    b1_pad = jnp.zeros((1, H_pad), jnp.float32).at[:, :H].set(params["b1"])
    w2_pad = jnp.zeros((H_pad, D_pad), jnp.float32).at[:H, :D].set(params["w2"])
    b2_pad = jnp.zeros((1, D_pad), jnp.float32).at[:, :D].set(params["b2"])

    # ---- stage 1: gather + segment-sum, one partial accumulator per core ----
    def seg_kernel(gd_ref, grp_ref, repr_ref, part_ref):
        t = pl.program_id(1)

        @pl.when(t == 0)
        def _init():
            part_ref[...] = jnp.zeros_like(part_ref)

        gd_tile = gd_ref[...]                     # (tm, 1)  int32
        grp_tile = grp_ref[...]                   # (1, tm)  int32

        # One-hot gather of the tm requested repr rows (MXU). Out-of-range
        # indices match nothing and therefore contribute zero.
        oh_gd = (jax.lax.broadcasted_iota(jnp.int32, (tm, N_pad), 1)
                 == gd_tile).astype(jnp.float32)                  # (tm, N_pad)
        rows = jnp.dot(oh_gd, repr_ref[...],
                       preferred_element_type=jnp.float32)        # (tm, D_pad)

        # One-hot segment-sum into the per-core accumulator (MXU).
        oh_grp = (jax.lax.broadcasted_iota(jnp.int32, (G_pad, tm), 0)
                  == grp_tile).astype(jnp.float32)                # (G_pad, tm)
        part_ref[...] += jnp.dot(oh_grp, rows,
                                 preferred_element_type=jnp.float32)

    seg_grid = pltpu.PrefetchScalarGridSpec(
        num_scalar_prefetch=0,
        grid=(n_parallel, steps),                 # reduction axis last
        in_specs=[
            pl.BlockSpec((tm, 1), lambda p, t: (p * steps + t, 0)),
            pl.BlockSpec((1, tm), lambda p, t: (0, p * steps + t)),
            pl.BlockSpec((N_pad, D_pad), lambda p, t: (0, 0)),    # resident
        ],
        out_specs=pl.BlockSpec((G_pad, D_pad), lambda p, t: (p, 0)),
    )

    flops = 2 * M_pad * (N_pad + G_pad) * D_pad
    bytes_accessed = 4 * (N_pad * D_pad + 2 * M_pad + n_parallel * G_pad * D_pad)

    partials = pl.pallas_call(
        seg_kernel,
        out_shape=jax.ShapeDtypeStruct((n_parallel * G_pad, D_pad), jnp.float32),
        grid_spec=seg_grid,
        compiler_params=pltpu.CompilerParams(
            dimension_semantics=("parallel", "arbitrary"),
        ),
        cost_estimate=pl.CostEstimate(flops=flops, transcendentals=0,
                                      bytes_accessed=bytes_accessed),
    )(gd_col, grp_row, repr_pad)

    # ---- stage 2: combine per-core partials + mlp_gd_process ----
    def mlp_kernel(part_ref, w1_ref, b1_ref, w2_ref, b2_ref, out_ref):
        acc = part_ref[0:G_pad, :]
        for p in range(1, n_parallel):            # static, tiny
            acc = acc + part_ref[p * G_pad:(p + 1) * G_pad, :]
        h = jnp.dot(acc, w1_ref[...], preferred_element_type=jnp.float32)
        h = jnp.maximum(h + b1_ref[...], 0.0)
        y = jnp.dot(h, w2_ref[...], preferred_element_type=jnp.float32)
        out_ref[...] = y + b2_ref[...]

    mlp_grid = pltpu.PrefetchScalarGridSpec(
        num_scalar_prefetch=0,
        grid=(1,),
        in_specs=[
            pl.BlockSpec((n_parallel * G_pad, D_pad), lambda i: (0, 0)),
            pl.BlockSpec((D_pad, H_pad), lambda i: (0, 0)),
            pl.BlockSpec((1, H_pad), lambda i: (0, 0)),
            pl.BlockSpec((H_pad, D_pad), lambda i: (0, 0)),
            pl.BlockSpec((1, D_pad), lambda i: (0, 0)),
        ],
        out_specs=pl.BlockSpec((G_pad, D_pad), lambda i: (0, 0)),
    )

    out_pad = pl.pallas_call(
        mlp_kernel,
        out_shape=jax.ShapeDtypeStruct((G_pad, D_pad), jnp.float32),
        grid_spec=mlp_grid,
    )(partials, w1_pad, b1_pad, w2_pad, b2_pad)

    return out_pad[:G, :D]


def reference(repr_x, gd, gd_len, params):
    G = gd_len.shape[0]
    M = gd.shape[0]
    grp = jnp.repeat(jnp.arange(G, dtype=jnp.int32), gd_len,
                     total_repeat_length=M)
    gathered = repr_x[gd]                                            # [M, D]
    gd_repr = jax.ops.segment_sum(gathered, grp, num_segments=G)     # [G, D]
    h = jnp.maximum(gd_repr @ params["w1"] + params["b1"], 0.0)
    return h @ params["w2"] + params["b2"]


if __name__ == "__main__":
    emb_dim = 32     # D
    n_nodes = 16     # N
    n_groups = 8     # G = number of links / gd groups
    key = jax.random.PRNGKey(0)
    k1, k2, k3, k4, k5, k6 = jax.random.split(key, 6)

    # graph node representations
    repr_x = jax.random.normal(k1, (n_nodes, emb_dim), dtype=jnp.float32)

    # vertical geodesic node indices + per-group counts (sum == M)
    gd_len = jnp.array([4, 12, 8, 8, 10, 6, 9, 7], dtype=jnp.int32)
    M = 64                                       # = sum(gd_len), kept static
    gd = jax.random.randint(k2, (M,), 0, n_nodes, dtype=jnp.int32)

    # mlp_gd_process params: Linear(D, 2D) -> ReLU -> Linear(2D, D)
    s1 = 1.0 / jnp.sqrt(jnp.float32(emb_dim))
    s2 = 1.0 / jnp.sqrt(jnp.float32(2 * emb_dim))
    params = {
        "w1": jax.random.uniform(k3, (emb_dim, 2 * emb_dim), jnp.float32, -s1, s1),
        "b1": jax.random.uniform(k4, (1, 2 * emb_dim), jnp.float32, -s1, s1),
        "w2": jax.random.uniform(k5, (2 * emb_dim, emb_dim), jnp.float32, -s2, s2),
        "b2": jax.random.uniform(k6, (1, emb_dim), jnp.float32, -s2, s2),
    }

    fwd = jax.jit(ver_gd_transform)
    out = jax.block_until_ready(fwd(repr_x, gd, gd_len, params))

    ref = reference(repr_x, gd, gd_len, params)
    assert out.shape == (n_groups, emb_dim)
    assert jnp.allclose(out, ref, atol=1e-4, rtol=1e-4), "mismatch vs reference"

    print("KERNEL_OK")
</pallas_src>

<mosaic_0001>
module attributes {stable_mosaic.version = 11 : i64} {
  func.func @seg_kernel(%arg0: i32, %arg1: i32, %arg2: memref<128x1xi32, #tpu.memory_space<vmem>>, %arg3: memref<1x128xi32, #tpu.memory_space<vmem>>, %arg4: memref<128x128xf32, #tpu.memory_space<vmem>>, %arg5: memref<8x128xf32, #tpu.memory_space<vmem>>) attributes {dimension_semantics = [#tpu.dimension_semantics<parallel>, #tpu.dimension_semantics<arbitrary>], iteration_bounds = array<i64: 2, 1>, scalar_prefetch = 0 : i64, scratch_operands = 0 : i64, tpu.core_type = #tpu.core_type<tc>, window_params = [{transform_indices = @transform_0, window_bounds = array<i64: 128, 1>}, {transform_indices = @transform_1, window_bounds = array<i64: 1, 128>}, {pipeline_mode = #tpu.pipeline_mode<synchronous>, transform_indices = @transform_2, window_bounds = array<i64: 128, 128>}, {transform_indices = @transform_3, window_bounds = array<i64: 8, 128>}]} {
    %c0_i32 = arith.constant 0 : i32
    %0 = arith.cmpi eq, %arg1, %c0_i32 : i32
    %1 = arith.extui %0 : i1 to i32
    %c0_i32_0 = arith.constant 0 : i32
    %2 = arith.cmpi ne, %1, %c0_i32_0 : i32
    scf.if %2 {
      %cst_11 = arith.constant 0.000000e+00 : f32
      %21 = vector.broadcast %cst_11 : f32 to vector<8x128xf32>
      %c0_12 = arith.constant 0 : index
      %c0_13 = arith.constant 0 : index
      %22 = vector.load %arg5[%c0_12, %c0_13] : memref<8x128xf32, #tpu.memory_space<vmem>>, vector<8x128xf32>
      tpu.vector_store %arg5[%c0_12, %c0_13], %21 {strides = array<i32>} : memref<8x128xf32, #tpu.memory_space<vmem>>, vector<8x128xf32>,
    } else {
    }
    %c0 = arith.constant 0 : index
    %c0_1 = arith.constant 0 : index
    %3 = vector.load %arg2[%c0, %c0_1] : memref<128x1xi32, #tpu.memory_space<vmem>>, vector<128x1xi32>
    %c0_2 = arith.constant 0 : index
    %c0_3 = arith.constant 0 : index
    %4 = vector.load %arg3[%c0_2, %c0_3] : memref<1x128xi32, #tpu.memory_space<vmem>>, vector<1x128xi32>
    %5 = tpu.iota {dimensions = array<i32: 1>} : vector<128x128xi32>
    %6 = vector.broadcast %3 : vector<128x1xi32> to vector<128x128xi32>
    %7 = arith.cmpi eq, %5, %6 : vector<128x128xi32>
    %8 = arith.extui %7 : vector<128x128xi1> to vector<128x128xi32>
    %9 = arith.sitofp %8 : vector<128x128xi32> to vector<128x128xf32>
    %c0_4 = arith.constant 0 : index
    %c0_5 = arith.constant 0 : index
    %10 = vector.load %arg4[%c0_4, %c0_5] : memref<128x128xf32, #tpu.memory_space<vmem>>, vector<128x128xf32>
    %cst = arith.constant dense<0.000000e+00> : vector<128x128xf32>
    %11 = tpu.matmul %9, %10, %cst {dimension_numbers = #tpu.dot_dimension_numbers<[1], [0], [0], [1], [0, 0, 1, 1], [], []>} : vector<128x128xf32>, vector<128x128xf32>, vector<128x128xf32> -> vector<128x128xf32>
    %12 = tpu.iota {dimensions = array<i32: 0>} : vector<8x128xi32>
    %13 = vector.broadcast %4 : vector<1x128xi32> to vector<8x128xi32>
    %14 = arith.cmpi eq, %12, %13 : vector<8x128xi32>
    %15 = arith.extui %14 : vector<8x128xi1> to vector<8x128xi32>
    %16 = arith.sitofp %15 : vector<8x128xi32> to vector<8x128xf32>
    %c0_6 = arith.constant 0 : index
    %c0_7 = arith.constant 0 : index
    %17 = vector.load %arg5[%c0_6, %c0_7] : memref<8x128xf32, #tpu.memory_space<vmem>>, vector<8x128xf32>
    %cst_8 = arith.constant dense<0.000000e+00> : vector<8x128xf32>
    %18 = tpu.matmul %16, %11, %cst_8 {dimension_numbers = #tpu.dot_dimension_numbers<[1], [0], [0], [1], [0, 0, 1, 1], [], []>} : vector<8x128xf32>, vector<128x128xf32>, vector<8x128xf32> -> vector<8x128xf32>
    %19 = arith.addf %17, %18 : vector<8x128xf32>
    %c0_9 = arith.constant 0 : index
    %c0_10 = arith.constant 0 : index
    %20 = vector.load %arg5[%c0_9, %c0_10] : memref<8x128xf32, #tpu.memory_space<vmem>>, vector<8x128xf32>
    tpu.vector_store %arg5[%c0_9, %c0_10], %19 {strides = array<i32>} : memref<8x128xf32, #tpu.memory_space<vmem>>, vector<8x128xf32>,
    return
  }
  func.func @transform_0(%arg0: i32, %arg1: i32) -> (i32, i32) {
    %c1_i32 = arith.constant 1 : i32
    %0 = arith.muli %arg0, %c1_i32 : i32
    %1 = arith.addi %0, %arg1 : i32
    %c0_i32 = arith.constant 0 : i32
    %c0_i32_0 = arith.constant 0 : i32
    return %1, %c0_i32 : i32, i32
  }
  func.func @transform_1(%arg0: i32, %arg1: i32) -> (i32, i32) {
    %c1_i32 = arith.constant 1 : i32
    %0 = arith.muli %arg0, %c1_i32 : i32
    %1 = arith.addi %0, %arg1 : i32
    %c0_i32 = arith.constant 0 : i32
    %c0_i32_0 = arith.constant 0 : i32
    return %c0_i32, %1 : i32, i32
  }
  func.func @transform_2(%arg0: i32, %arg1: i32) -> (i32, i32) {
    %c0_i32 = arith.constant 0 : i32
    %c0_i32_0 = arith.constant 0 : i32
    %c0_i32_1 = arith.constant 0 : i32
    return %c0_i32, %c0_i32_0 : i32, i32
  }
  func.func @transform_3(%arg0: i32, %arg1: i32) -> (i32, i32) {
    %c0_i32 = arith.constant 0 : i32
    %c0_i32_0 = arith.constant 0 : i32
    return %arg0, %c0_i32 : i32, i32
  }
}

module attributes {stable_mosaic.version = 11 : i64} {
  func.func @mlp_kernel(%arg0: i32, %arg1: memref<16x128xf32, #tpu.memory_space<vmem>>, %arg2: memref<128x128xf32, #tpu.memory_space<vmem>>, %arg3: memref<1x128xf32, #tpu.memory_space<vmem>>, %arg4: memref<128x128xf32, #tpu.memory_space<vmem>>, %arg5: memref<1x128xf32, #tpu.memory_space<vmem>>, %arg6: memref<8x128xf32, #tpu.memory_space<vmem>>) attributes {dimension_semantics = [#tpu.dimension_semantics<arbitrary>], iteration_bounds = array<i64: 1>, scalar_prefetch = 0 : i64, scratch_operands = 0 : i64, tpu.core_type = #tpu.core_type<tc>, window_params = [{pipeline_mode = #tpu.pipeline_mode<synchronous>, transform_indices = @transform_0, window_bounds = array<i64: 16, 128>}, {pipeline_mode = #tpu.pipeline_mode<synchronous>, transform_indices = @transform_1, window_bounds = array<i64: 128, 128>}, {pipeline_mode = #tpu.pipeline_mode<synchronous>, transform_indices = @transform_2, window_bounds = array<i64: 1, 128>}, {pipeline_mode = #tpu.pipeline_mode<synchronous>, transform_indices = @transform_3, window_bounds = array<i64: 128, 128>}, {pipeline_mode = #tpu.pipeline_mode<synchronous>, transform_indices = @transform_4, window_bounds = array<i64: 1, 128>}, {pipeline_mode = #tpu.pipeline_mode<synchronous>, transform_indices = @transform_5, window_bounds = array<i64: 8, 128>}]} {
    %c0 = arith.constant 0 : index
    %c0_0 = arith.constant 0 : index
    %0 = vector.load %arg1[%c0, %c0_0] : memref<16x128xf32, #tpu.memory_space<vmem>>, vector<8x128xf32>
    %c8 = arith.constant 8 : index
    %c0_1 = arith.constant 0 : index
    %1 = vector.load %arg1[%c8, %c0_1] : memref<16x128xf32, #tpu.memory_space<vmem>>, vector<8x128xf32>
    %2 = arith.addf %0, %1 : vector<8x128xf32>
    %c0_2 = arith.constant 0 : index
    %c0_3 = arith.constant 0 : index
    %3 = vector.load %arg2[%c0_2, %c0_3] : memref<128x128xf32, #tpu.memory_space<vmem>>, vector<128x128xf32>
    %cst = arith.constant dense<0.000000e+00> : vector<8x128xf32>
    %4 = tpu.matmul %2, %3, %cst {dimension_numbers = #tpu.dot_dimension_numbers<[1], [0], [0], [1], [0, 0, 1, 1], [], []>} : vector<8x128xf32>, vector<128x128xf32>, vector<8x128xf32> -> vector<8x128xf32>
    %c0_4 = arith.constant 0 : index
    %c0_5 = arith.constant 0 : index
    %5 = vector.load %arg3[%c0_4, %c0_5] : memref<1x128xf32, #tpu.memory_space<vmem>>, vector<1x128xf32>
    %6 = vector.broadcast %5 : vector<1x128xf32> to vector<8x128xf32>
    %7 = arith.addf %4, %6 : vector<8x128xf32>
    %cst_6 = arith.constant 0.000000e+00 : f32
    %8 = vector.broadcast %cst_6 : f32 to vector<8x128xf32>
    %9 = arith.maximumf %7, %8 : vector<8x128xf32>
    %c0_7 = arith.constant 0 : index
    %c0_8 = arith.constant 0 : index
    %10 = vector.load %arg4[%c0_7, %c0_8] : memref<128x128xf32, #tpu.memory_space<vmem>>, vector<128x128xf32>
    %cst_9 = arith.constant dense<0.000000e+00> : vector<8x128xf32>
    %11 = tpu.matmul %9, %10, %cst_9 {dimension_numbers = #tpu.dot_dimension_numbers<[1], [0], [0], [1], [0, 0, 1, 1], [], []>} : vector<8x128xf32>, vector<128x128xf32>, vector<8x128xf32> -> vector<8x128xf32>
    %c0_10 = arith.constant 0 : index
    %c0_11 = arith.constant 0 : index
    %12 = vector.load %arg5[%c0_10, %c0_11] : memref<1x128xf32, #tpu.memory_space<vmem>>, vector<1x128xf32>
    %13 = vector.broadcast %12 : vector<1x128xf32> to vector<8x128xf32>
    %14 = arith.addf %11, %13 : vector<8x128xf32>
    %c0_12 = arith.constant 0 : index
    %c0_13 = arith.constant 0 : index
    %15 = vector.load %arg6[%c0_12, %c0_13] : memref<8x128xf32, #tpu.memory_space<vmem>>, vector<8x128xf32>
    tpu.vector_store %arg6[%c0_12, %c0_13], %14 {strides = array<i32>} : memref<8x128xf32, #tpu.memory_space<vmem>>, vector<8x128xf32>,
    return
  }
  func.func @transform_0(%arg0: i32) -> (i32, i32) {
    %c0_i32 = arith.constant 0 : i32
    %c0_i32_0 = arith.constant 0 : i32
    %c0_i32_1 = arith.constant 0 : i32
    return %c0_i32, %c0_i32_0 : i32, i32
  }
  func.func @transform_1(%arg0: i32) -> (i32, i32) {
    %c0_i32 = arith.constant 0 : i32
    %c0_i32_0 = arith.constant 0 : i32
    %c0_i32_1 = arith.constant 0 : i32
    return %c0_i32, %c0_i32_0 : i32, i32
  }
  func.func @transform_2(%arg0: i32) -> (i32, i32) {
    %c0_i32 = arith.constant 0 : i32
    %c0_i32_0 = arith.constant 0 : i32
    %c0_i32_1 = arith.constant 0 : i32
    return %c0_i32, %c0_i32_0 : i32, i32
  }
  func.func @transform_3(%arg0: i32) -> (i32, i32) {
    %c0_i32 = arith.constant 0 : i32
    %c0_i32_0 = arith.constant 0 : i32
    %c0_i32_1 = arith.constant 0 : i32
    return %c0_i32, %c0_i32_0 : i32, i32
  }
  func.func @transform_4(%arg0: i32) -> (i32, i32) {
    %c0_i32 = arith.constant 0 : i32
    %c0_i32_0 = arith.constant 0 : i32
    %c0_i32_1 = arith.constant 0 : i32
    return %c0_i32, %c0_i32_0 : i32, i32
  }
  func.func @transform_5(%arg0: i32) -> (i32, i32) {
    %c0_i32 = arith.constant 0 : i32
    %c0_i32_0 = arith.constant 0 : i32
    %c0_i32_1 = arith.constant 0 : i32
    return %c0_i32, %c0_i32_0 : i32, i32
  }
}

</mosaic_0001>

<bundles_post_ra>
// kernel: ver_gd_transform.3
= control target key start
LH: loop header
LB: loop body
LE: loop exit
PB: predicated region body
PF: predicated region fallthrough
CT: control target
= control target key end

     0   :  { %v408_v3 = vmov 0.0|0.0   ;;  %vm409_vm0 = vmmov 0   ;;  %v410_v6 = vmov 0.0   ;;  %s578_s0 = inlined_call_operand.vmem [shape: f32[16,128], index: 0, kind: input, shape index: {}]   ;;  %s579_s1 = inlined_call_operand.vmem [shape: f32[128,128], index: 1, kind: input, shape index: {}]   ;;  %s580_s2 = inlined_call_operand.vmem [shape: f32[1,128], index: 2, kind: input, shape index: {}]   ;;  %s581_s3 = inlined_call_operand.vmem [shape: f32[128,128], index: 3, kind: input, shape index: {}]   ;;  %s582_s4 = inlined_call_operand.vmem [shape: f32[1,128], index: 4, kind: input, shape index: {}]   ;;  %s583_s5 = inlined_call_operand.hbm [shape: f32[8,128], index: 5, kind: output, shape index: {}]  }
   0x1   :  { %v24_v0 = vld [vmem:[%s579_s1] sm:$0xff]  ;;  %v25_v1 = vld [vmem:[%s579_s1 + $0x8] sm:$0xff]  ;;  %v26_v2 = vld [vmem:[%s579_s1 + $0x10] sm:$0xff]  ;;  %332 = vmatprep.subr.bf16.mxu0 %v408_v3  ;;  %294 = vmatprep.mubr.msk.f32.mxu0 %vm409_vm0, %v410_v6 }
   0x2   :  { %v333_v4 = vpack.c.bf16 %v25_v1, %v24_v0  ;;  %v27_v5 = vld [vmem:[%s579_s1 + $0x18] sm:$0xff]  ;;  %356 = vmatprep.subr.bf16.mxu1 %v408_v3  ;;  %329 = vmatprep.mubr.msk.f32.mxu1 %vm409_vm0, %v410_v6  ;;  %v28_v8 = vld [vmem:[%s579_s1 + $0x20] sm:$0xff]  ;;  %v29_v9 = vld [vmem:[%s579_s1 + $0x28] sm:$0xff] }
   0x3   :  { %v336_v7 = vpack.c.bf16 %v27_v5, %v26_v2  ;;  %v118_v10 = vld [vmem:[%s581_s3] sm:$0xff]  ;;  %v119_v11 = vld [vmem:[%s581_s3 + $0x8] sm:$0xff]  ;;  %v120_v12 = vld [vmem:[%s581_s3 + $0x10] sm:$0xff]  ;;  %v339_v13 = vpack.c.bf16 %v29_v9, %v28_v8 }
   0x4   :  { %334 = vmatpush3.bf16.msra.mxu0 %v333_v4  ;;  %v357_v14 = vpack.c.bf16 %v119_v11, %v118_v10  ;;  %v121_v15 = vld [vmem:[%s581_s3 + $0x18] sm:$0xff]  ;;  %v30_v16 = vld [vmem:[%s579_s1 + $0x30] sm:$0xff]  ;;  %v122_v19 = vld [vmem:[%s581_s3 + $0x20] sm:$0xff] }
   0x5   :  { %335 = vmatprep.subr.bf16.mxu0 %v408_v3  ;;  %v31_v17 = vld [vmem:[%s579_s1 + $0x38] sm:$0xff]  ;;  %v360_v18 = vpack.c.bf16 %v121_v15, %v120_v12  ;;  %v123_v20 = vld [vmem:[%s581_s3 + $0x28] sm:$0xff] }
   0x6   :  { %358 = vmatpush3.bf16.msra.mxu1 %v357_v14  ;;  %v342_v21 = vpack.c.bf16 %v31_v17, %v30_v16 }
   0x7   :  { %359 = vmatprep.subr.bf16.mxu1 %v408_v3 }
   0x8   :  { %337 = vmatpush3.bf16.msra.mxu0 %v336_v7 }
   0x9   :  { %338 = vmatprep.subr.bf16.mxu0 %v408_v3 }
   0xc   :  { %340 = vmatpush3.bf16.msra.mxu0 %v339_v13 }
   0xd   :  { %10 = vsyncpa [#allocation3], 0  ;;  %341 = vmatprep.subr.bf16.mxu0 %v408_v3  ;;  %v32_v22 = vld [vmem:[%s579_s1 + $0x40] sm:$0xff]  ;;  %v33_v23 = vld [vmem:[%s579_s1 + $0x48] sm:$0xff]  ;;  %361 = vmatpush3.bf16.msra.mxu1 %v360_v18  ;;  %v363_v24 = vpack.c.bf16 %v123_v20, %v122_v19  ;;  %s411_s13 = smov [#allocation2]  }
   0xe   :  { %362 = vmatprep.subr.bf16.mxu1 %v408_v3  ;;  %v124_v25 = vld [vmem:[%s581_s3 + $0x30] sm:$0xff]  ;;  %v125_v26 = vld [vmem:[%s581_s3 + $0x38] sm:$0xff]  ;;  %v345_v27 = vpack.c.bf16 %v33_v23, %v32_v22  ;;  %v126_v31 = vld [vmem:[%s581_s3 + $0x40] sm:$0xff]  ;;  %s218_s14 = sshll.u32 %s411_s13, 4  ;;  %s219_s14 = int_to_ptr.vmem [resolvable:$true] %s218_s14 }
   0xf   :  { %v34_v28 = vld [vmem:[%s579_s1 + $0x50] sm:$0xff]  ;;  %v35_v29 = vld [vmem:[%s579_s1 + $0x58] sm:$0xff]  ;;  %v366_v30 = vpack.c.bf16 %v125_v26, %v124_v25  ;;  %v127_v32 = vld [vmem:[%s581_s3 + $0x48] sm:$0xff]  ;;  %p389_p1 = scmp.lt.s32.totalorder %s219_s14, %s219_s14 }
  0x10   :  { %343 = vmatpush3.bf16.msra.mxu0 %v342_v21  ;;  %v348_v33 = vpack.c.bf16 %v35_v29, %v34_v28  ;;  %v36_v34 = vld [vmem:[%s579_s1 + $0x60] sm:$0xff]  ;;  %v37_v35 = vld [vmem:[%s579_s1 + $0x68] sm:$0xff]  ;;  %v369_v36 = vpack.c.bf16 %v127_v32, %v126_v31  ;;  %v128_v37 = vld [vmem:[%s581_s3 + $0x50] sm:$0xff] }
  0x11   :  { %344 = vmatprep.subr.bf16.mxu0 %v408_v3  ;;  %364 = vmatpush3.bf16.msra.mxu1 %v363_v24  ;;  %v129_v38 = vld [vmem:[%s581_s3 + $0x58] sm:$0xff]  ;;  %v351_v39 = vpack.c.bf16 %v37_v35, %v36_v34  ;;  %v38_v40 = vld [vmem:[%s579_s1 + $0x70] sm:$0xff]  ;;  %v130_v43 = vld [vmem:[%s581_s3 + $0x60] sm:$0xff] }
  0x12   :  { %365 = vmatprep.subr.bf16.mxu1 %v408_v3  ;;  %v39_v41 = vld [vmem:[%s579_s1 + $0x78] sm:$0xff]  ;;  %v372_v42 = vpack.c.bf16 %v129_v38, %v128_v37  ;;  %v131_v44 = vld [vmem:[%s581_s3 + $0x68] sm:$0xff]  ;;  %v21_v46 = vld [vmem:[%s578_s0] sm:$0xff] }
  0x13   :  { %v354_v45 = vpack.c.bf16 %v39_v41, %v38_v40  ;;  %v22_v47 = vld [vmem:[%s578_s0 + $0x8] sm:$0xff]  ;;  %v375_v48 = vpack.c.bf16 %v131_v44, %v130_v43  ;;  %v132_v50 = vld [vmem:[%s581_s3 + $0x70] sm:$0xff]  ;;  %v133_v51 = vld [vmem:[%s581_s3 + $0x78] sm:$0xff]  ;;  %s384_s3 = scalar_lea.vmem %s219_s14, 128 }
  0x14   :  { %346 = vmatpush3.bf16.msra.mxu0 %v345_v27  ;;  %v23_v49 = vadd.f32 %v22_v47, %v21_v46  ;;  %v378_v52 = vpack.c.bf16 %v133_v51, %v132_v50  ;;  %v226_v53 = vld [vmem:[%s580_s2] ss:$0 sm:$0xff]  ;;  %p385_p0 = scmp.ne.s32.totalorder %s219_s14, %s384_s3  ;;  %p390_p2 = scmp.lt.s32.totalorder %s384_s3, %s384_s3 }
  0x15   :  { %347 = vmatprep.subr.bf16.mxu0 %v408_v3  ;;  %367 = vmatpush3.bf16.msra.mxu1 %v366_v30  ;;  %v227_v58 = vld [vmem:[%s582_s4] ss:$0 sm:$0xff] }
  0x16   :  { %368 = vmatprep.subr.bf16.mxu1 %v408_v3  ;;  %p391_p3 = por %p390_p2, %p389_p1 }
  0x18   :  { %349 = vmatpush3.bf16.msra.mxu0 %v348_v33  ;;  %p392_p4 = pnand %p391_p3, %p385_p0 }
  0x19   :  { %350 = vmatprep.subr.bf16.mxu0 %v408_v3  ;;  %370 = vmatpush3.bf16.msra.mxu1 %v369_v36 }
  0x1a   :  { %371 = vmatprep.subr.bf16.mxu1 %v408_v3 }
  0x1c   :  { %352 = vmatpush3.bf16.msra.mxu0 %v351_v39 }
  0x1d   :  { %353 = vmatprep.subr.bf16.mxu0 %v408_v3  ;;  %373 = vmatpush3.bf16.msra.mxu1 %v372_v42 }
  0x1e   :  { %374 = vmatprep.subr.bf16.mxu1 %v408_v3 }
  0x20   :  { %355 = vmatpush3.bf16.msra.mxu0 %v354_v45 }
  0x21   :  { %376 = vmatpush3.bf16.msra.mxu1 %v375_v48 }
  0x22   :  { %377 = vmatprep.subr.bf16.mxu1 %v408_v3 }
  0x23   :  { %295 = vmatmul.mubr.f32.vlgmr.msra.gmra.mrb[0].mxu0 %v23_v49 }
  0x25   :  { %379 = vmatpush3.bf16.msra.mxu1 %v378_v52 }
  0xf6   :  { %v113_v54 = vpop.f32.mrb[0].mxu0 }
  0xf7   :  { %v114_v55 = vadd.f32 %v226_v53, %v113_v54  ;;  %v296_v56 = vpop.f32.mrb[1].mxu0 }
  0xf9   :  { %v117_v57 = vmax.f32 %v114_v55, 0.0 }
  0xfb   :  { %330 = vmatmul.mubr.f32.vlgmr.msra.gmra.mrb[0].mxu1 %v117_v57 }
 0x1ce   :  { %v207_v59 = vpop.f32.mrb[0].mxu1 }
 0x1cf   :  { %v208_v60 = vadd.f32 %v227_v58, %v207_v59  ;;  %v331_v61 = vpop.f32.mrb[1].mxu1 }
 0x1d1   :  { %211 = vst [vmem:[#allocation2] sm:$0xff] %v208_v60 }
 0x1d2   :  { %395 = shalt.err (!%p392_p4)
}
 0x1d3   :  { %s396_s16 = scalar_lea.hbm %s583_s5, 128 }
 0x1d4   :  { %p397_p5 = scmp.ne.s32.totalorder %s583_s5, %s396_s16  ;;  %p400_p6 = scmp.lt.u32.totalorder %s396_s16, %s583_s5 }
 0x1d6   :  { %p402_p7 = pnand %p400_p6, %p397_p5 }
 0x1d8   :  { %405 = shalt.err (!%p402_p7)
}
 0x1d9   :  { %221 = dma.vmem_to_hbm [thread:$0]  %s219_s14, 128, %s583_s5, [#allocation3]  }
 0x1da   :  { %406 = dma.done.wait [#allocation3], 128  }
 0x1db   :  { %407 = vsyncadd [#allocation3], 4294967168 }
 0x1dc   :  { %225 = vsyncpa [#allocation3], 1 }

// kernel: ver_gd_transform.2
= control target key start
LH: loop header
LB: loop body
LE: loop exit
PB: predicated region body
PF: predicated region fallthrough
CT: control target
= control target key end

     0   :  { %s965_s12 = smov 0   ;;  %s967_s13 = smov 0   ;;  %s1091_s0 = inlined_call_operand.vmem [shape: s32[256,1], index: 0, kind: input, shape index: {}]   ;;  %s1092_s1 = inlined_call_operand.vmem [shape: s32[1,256], index: 1, kind: input, shape index: {}]   ;;  %s1093_s2 = inlined_call_operand.vmem [shape: f32[128,128], index: 2, kind: input, shape index: {}]   ;;  %s1094_s3 = inlined_call_operand.vmem [shape: f32[16,128], index: 3, kind: output, shape index: {}]  }
   0x1   :  { %s969_s14 = smov 0  }
   0x2 LB: > { %s25_s15 = sadd.s32 1, %s934_s13  ;;  %p648_p0 = scmp.ge.s32.totalorder %s938_s14, 1  ;;  %s938_s14 = sphi %s969_s14, %s13_s14   ;;  %s934_s13 = sphi %s967_s13, %s1096_s13   ;;  %s930_s12 = sphi %s965_s12, %s1095_s12  }
   0x3   : > { %p27_p1 = scmp.ge.s32.totalorder %s25_s15, 2  ;;  %p166_p2 = scmp.lt.s32.totalorder %s938_s14, 3 }
   0x5   : > { %s1098_s15 = smov (%p27_p1, %s25_s15), 0  ;;  %p167_p3 = pnand %p648_p0, %p166_p2 }
   0x6   : > { %s649_s16 = sshll.u32 (!%p167_p3), %s930_s12, 4  ;;  %v331_v0 = vld [vmem:[%s1093_s2] sm:$0xff] (!%p167_p3)  ;;  %v332_v1 = vld [vmem:[%s1093_s2 + $0x8] sm:$0xff] (!%p167_p3)  ;;  %v333_v2 = vld [vmem:[%s1093_s2 + $0x10] sm:$0xff] (!%p167_p3)  ;;  %v940_v3 = vmov (!%p167_p3), 0   ;;  %v233_v41 = vlaneseq (!%p167_p3)  ;;  %v941_v45 = vmov (!%p167_p3), 1.0  }
   0x7   : > { %170 = sbr.rel (%p167_p3) target bundleno = 610 (0x262), region = 32  ;;  %915 = vset.pattern.permute.xlu1 (!%p167_p3), %v940_v3  ;;  %914 = vset.pattern.permute.xlu0 (!%p167_p3), %v940_v3  ;;  %p196_p4 = scmp.lt.s32.totalorder (!%p167_p3), %s649_s16, 31  ;;  %v829_v4 = vpack.c.bf16 (!%p167_p3), %v332_v1, %v331_v0  ;;  %v334_v5 = vld [vmem:[%s1093_s2 + $0x18] sm:$0xff] (!%p167_p3)  ;;  %v335_v7 = vld [vmem:[%s1093_s2 + $0x20] sm:$0xff] (!%p167_p3)  ;;  %v336_v8 = vld [vmem:[%s1093_s2 + $0x28] sm:$0xff] (!%p167_p3)  ;;  %v942_v60 = vmov (!%p167_p3), 0.0|0.0  }
   0x8   : > { %v833_v6 = vpack.c.bf16 (!%p167_p3), %v334_v5, %v333_v2  ;;  %v837_v9 = vpack.c.bf16 (!%p167_p3), %v336_v8, %v335_v7  ;;  %v337_v10 = vld [vmem:[%s1093_s2 + $0x30] sm:$0xff] (!%p167_p3)  ;;  %v338_v13 = vld [vmem:[%s1093_s2 + $0x38] sm:$0xff] (!%p167_p3)  ;;  %v339_v17 = vld [vmem:[%s1093_s2 + $0x40] sm:$0xff] (!%p167_p3)  ;;  %v234_v42 = vand.u32 (!%p167_p3), 127, %v233_v41  ;;  %861 = vmatprep.subr.bf16.mxu1 (!%p167_p3), %v942_v60  ;;  %v944_v61 = vmov (!%p167_p3), 0.0   ;;  %p203_p5 = scmp.lt.s32.totalorder (!%p167_p3), %s930_s12, 1 }
   0x9   : > { %830 = vmatprep.subr.bf16.mxu0 (!%p167_p3), %v829_v4  ;;  %v841_v16 = vpack.c.bf16 (!%p167_p3), %v338_v13, %v337_v10  ;;  %v340_v18 = vld [vmem:[%s1093_s2 + $0x48] sm:$0xff] (!%p167_p3)  ;;  %v341_v22 = vld [vmem:[%s1093_s2 + $0x50] sm:$0xff] (!%p167_p3)  ;;  %v342_v23 = vld [vmem:[%s1093_s2 + $0x58] sm:$0xff] (!%p167_p3) }
   0xa   : > { %832 = vmatpush3.bf16.msra.mxu0 (!%p167_p3), %v829_v4  ;;  %v845_v21 = vpack.c.bf16 (!%p167_p3), %v340_v18, %v339_v17  ;;  %v849_v26 = vpack.c.bf16 (!%p167_p3), %v342_v23, %v341_v22  ;;  %v343_v27 = vld [vmem:[%s1093_s2 + $0x60] sm:$0xff] (!%p167_p3)  ;;  %v344_v28 = vld [vmem:[%s1093_s2 + $0x68] sm:$0xff] (!%p167_p3)  ;;  %v345_v32 = vld [vmem:[%s1093_s2 + $0x70] sm:$0xff] (!%p167_p3) }
   0xb   : > { %834 = vmatprep.subr.bf16.mxu0 (!%p167_p3), %v833_v6  ;;  %v853_v31 = vpack.c.bf16 (!%p167_p3), %v344_v28, %v343_v27  ;;  %v346_v33 = vld [vmem:[%s1093_s2 + $0x78] sm:$0xff] (!%p167_p3) }
   0xc   : > { %v857_v36 = vpack.c.bf16 (!%p167_p3), %v346_v33, %v345_v32 }
   0xe   : > { %s1100_s16 = smov (!%p196_p4, %s649_s16), 31  ;;  %836 = vmatpush3.bf16.msra.mxu0 %v833_v6  ;;  %s1102_s12 = smov (!%p203_p5, %s930_s12), 1 }
   0xf   : > { %s650_s29 = sshll.u32 %s1100_s16, 3  ;;  %838 = vmatprep.subr.bf16.mxu0 %v837_v9  ;;  %s651_s6 = sshll.u32 %s1102_s12, 3 }
  0x10   : > { %s1007_s5 = scalar_lea.vmem %s1091_s0, %s650_s29  ;;  %s210_s9 = scalar_lea.vmem %s1094_s3, %s651_s6 }
  0x11   : > { %v218_v11 = vld [vmem:[%s1007_s5 + $0x10] sm:$0xff]  ;;  %v216_v12 = vld [vmem:[%s1007_s5] sm:$0xff]  ;;  %v219_v14 = vld [vmem:[%s1007_s5 + $0x18] sm:$0xff] }
  0x12   : > { %242 = vperm.xlu1 %915, %v218_v11   ;;  %236 = vperm.xlu0 %914, %v216_v12   ;;  %v217_v15 = vld [vmem:[%s1007_s5 + $0x8] sm:$0xff]  ;;  %v220_v20 = vld [vmem:[%s1007_s5 + $0x20] sm:$0xff]  ;;  %v223_v24 = vld [vmem:[%s1007_s5 + $0x38] sm:$0xff] }
  0x13   : > { %v221_v19 = vld [vmem:[%s1007_s5 + $0x28] sm:$0xff]  ;;  %840 = vmatpush3.bf16.msra.mxu0 %v837_v9  ;;  %v222_v25 = vld [vmem:[%s1007_s5 + $0x30] sm:$0xff]  ;;  %v224_v30 = vld [vmem:[%s1007_s5 + $0x40] sm:$0xff] }
  0x14   : > { %842 = vmatprep.subr.bf16.mxu0 %v841_v16  ;;  %v225_v29 = vld [vmem:[%s1007_s5 + $0x48] sm:$0xff]  ;;  %v227_v34 = vld [vmem:[%s1007_s5 + $0x58] sm:$0xff]  ;;  %v226_v35 = vld [vmem:[%s1007_s5 + $0x50] sm:$0xff] }
  0x15   : > { %v229_v37 = vld [vmem:[%s1007_s5 + $0x68] sm:$0xff]  ;;  %v228_v38 = vld [vmem:[%s1007_s5 + $0x60] sm:$0xff]  ;;  %v231_v39 = vld [vmem:[%s1007_s5 + $0x78] sm:$0xff] }
  0x16   : > { %245 = vperm.xlu1 %915, %v219_v14   ;;  %239 = vperm.xlu0 %914, %v217_v15   ;;  %v230_v40 = vld [vmem:[%s1007_s5 + $0x70] sm:$0xff]  ;;  %s205_s5 = scalar_lea.vmem %s1092_s1, %s1102_s12 }
  0x17   : > { %844 = vmatpush3.bf16.msra.mxu0 %v841_v16  ;;  %v684_v22 = vld [vmem:[%s205_s5] ss:$0 sm:$0xff] }
  0x18   : > { %846 = vmatprep.subr.bf16.mxu0 %v845_v21 }
  0x1a   : > { %251 = vperm.xlu1 %915, %v221_v19   ;;  %248 = vperm.xlu0 %914, %v220_v20   ;;  %v493_v20 = vshrl.u32 %v233_v41, 7 }
  0x1b   : > { %848 = vmatpush3.bf16.msra.mxu0 %v845_v21 }
  0x1c   : > { %850 = vmatprep.subr.bf16.mxu0 %v849_v26 }
  0x1e   : > { %257 = vperm.xlu1 %915, %v223_v24   ;;  %254 = vperm.xlu0 %914, %v222_v25  }
  0x1f   : > { %852 = vmatpush3.bf16.msra.mxu0 %v849_v26 }
  0x20   : > { %854 = vmatprep.subr.bf16.mxu0 %v853_v31 }
  0x22   : > { %263 = vperm.xlu1 %915, %v225_v29   ;;  %260 = vperm.xlu0 %914, %v224_v30  }
  0x23   : > { %856 = vmatpush3.bf16.msra.mxu0 %v853_v31 }
  0x24   : > { %858 = vmatprep.subr.bf16.mxu0 %v857_v36 }
  0x26   : > { %269 = vperm.xlu1 %915, %v227_v34   ;;  %266 = vperm.xlu0 %914, %v226_v35  }
  0x27   : > { %860 = vmatpush3.bf16.msra.mxu0 %v857_v36 }
  0x2a   : > { %275 = vperm.xlu1 %915, %v229_v37   ;;  %272 = vperm.xlu0 %914, %v228_v38  }
  0x2e   : > { %281 = vperm.xlu1 %915, %v231_v39   ;;  %278 = vperm.xlu0 %914, %v230_v40  }
  0x91   : > { %v243_v43 = vpop.permute.xlu1 %242  ;;  %v237_v44 = vpop.permute.xlu0 %236 }
  0x92   : > { %vm283_vm0 = vcmp.eq.s32.totalorder %v234_v42, %v237_v44  ;;  %vm285_vm1 = vcmp.eq.s32.totalorder %v234_v42, %v243_v43 }
  0x93   : > { %770 = vmatprep.mubr.msk.f32.mxu0 %vm283_vm0, %v941_v45  ;;  %vm943_vm0 = vmmov 0  }
  0x94   : > { %826 = vmatprep.mubr.msk.f32.mxu1 %vm943_vm0, %v944_v61 }
  0x95   : > { %v246_v46 = vpop.permute.xlu1 %245  ;;  %v240_v47 = vpop.permute.xlu0 %239 }
  0x96   : > { %vm284_vm2 = vcmp.eq.s32.totalorder %v234_v42, %v240_v47  ;;  %vm286_vm3 = vcmp.eq.s32.totalorder %v234_v42, %v246_v46 }
  0x97   : > { %771 = vmatmul.mubr.msk.f32.vlgmr.msra.gmra.mrb[0].mxu0 %vm284_vm2, %v941_v45 }
  0x98   : > { %773 = vmatprep.mubr.msk.f32.mxu0 %vm285_vm1, %v941_v45  ;;  %vm498_vm1 = vcmp.eq.s32.totalorder %v493_v20, %v684_v22 }
  0x99   : > { %v252_v48 = vpop.permute.xlu1 %251  ;;  %v249_v49 = vpop.permute.xlu0 %248 }
  0x9a   : > { %vm287_vm4 = vcmp.eq.s32.totalorder %v234_v42, %v249_v49  ;;  %vm288_vm5 = vcmp.eq.s32.totalorder %v234_v42, %v252_v48 }
  0x9b   : > { %774 = vmatmul.mubr.msk.f32.gmra.mrb[2].mxu0 %vm286_vm3, %v941_v45 }
  0x9c   : > { %776 = vmatprep.mubr.msk.f32.mxu0 %vm287_vm4, %v941_v45 }
  0x9d   : > { %v258_v50 = vpop.permute.xlu1 %257  ;;  %v255_v51 = vpop.permute.xlu0 %254 }
  0x9e   : > { %vm289_vm6 = vcmp.eq.s32.totalorder %v234_v42, %v255_v51  ;;  %vm290_vm7 = vcmp.eq.s32.totalorder %v234_v42, %v258_v50 }
  0x9f   : > { %777 = vmatmul.mubr.msk.f32.gmra.mrb[4].mxu0 %vm288_vm5, %v941_v45 }
  0xa0   : > { %779 = vmatprep.mubr.msk.f32.mxu0 %vm289_vm6, %v941_v45 }
  0xa1   : > { %v264_v52 = vpop.permute.xlu1 %263  ;;  %v261_v53 = vpop.permute.xlu0 %260 }
  0xa2   : > { %vm291_vm8 = vcmp.eq.s32.totalorder %v234_v42, %v261_v53  ;;  %vm292_vm9 = vcmp.eq.s32.totalorder %v234_v42, %v264_v52 }
  0xa3   : > { %780 = vmatmul.mubr.msk.f32.gmra.mrb[6].mxu0 %vm290_vm7, %v941_v45 }
  0xa4   : > { %782 = vmatprep.mubr.msk.f32.mxu0 %vm291_vm8, %v941_v45 }
  0xa5   : > { %v270_v54 = vpop.permute.xlu1 %269  ;;  %v267_v55 = vpop.permute.xlu0 %266 }
  0xa6   : > { %vm293_vm10 = vcmp.eq.s32.totalorder %v234_v42, %v267_v55  ;;  %vm294_vm11 = vcmp.eq.s32.totalorder %v234_v42, %v270_v54 }
  0xa7   : > { %783 = vmatmul.mubr.msk.f32.gmra.mrb[8].mxu0 %vm292_vm9, %v941_v45 }
  0xa8   : > { %785 = vmatprep.mubr.msk.f32.mxu0 %vm293_vm10, %v941_v45 }
  0xa9   : > { %v276_v56 = vpop.permute.xlu1 %275  ;;  %v273_v57 = vpop.permute.xlu0 %272 }
  0xaa   : > { %vm295_vm12 = vcmp.eq.s32.totalorder %v234_v42, %v273_v57  ;;  %vm296_vm13 = vcmp.eq.s32.totalorder %v234_v42, %v276_v56 }
  0xab   : > { %786 = vmatmul.mubr.msk.f32.gmra.mrb[10].mxu0 %vm294_vm11, %v941_v45 }
  0xac   : > { %788 = vmatprep.mubr.msk.f32.mxu0 %vm295_vm12, %v941_v45 }
  0xad   : > { %v279_v58 = vpop.permute.xlu0 %278  ;;  %v282_v59 = vpop.permute.xlu1 %281 }
  0xae   : > { %vm297_vm14 = vcmp.eq.s32.totalorder %v234_v42, %v279_v58  ;;  %vm298_vm15 = vcmp.eq.s32.totalorder %v234_v42, %v282_v59 }
  0xaf   : > { %789 = vmatmul.mubr.msk.f32.gmra.mrb[12].mxu0 %vm296_vm13, %v941_v45 }
  0xb0   : > { %791 = vmatprep.mubr.msk.f32.mxu0 %vm297_vm14, %v941_v45 }
  0xb3   : > { %792 = vmatmul.mubr.msk.f32.gmra.mrb[14].mxu0 %vm298_vm15, %v941_v45 }
 0x16a   : > { %v772_v62 = vpop.f32.mrb[0].mxu0 }
 0x16b   : > { %v413_v63 = vpop.f32.mrb[1].mxu0 }
 0x16c   : > { %v862_v0 = vpack.c.bf16 %v772_v62, %v413_v63 }
 0x16e   : > { %v775_v1 = vpop.f32.mrb[2].mxu0  ;;  %863 = vmatpush3.bf16.msra.mxu1 %v862_v0 }
 0x16f   : > { %v423_v2 = vpop.f32.mrb[3].mxu0  ;;  %864 = vmatprep.subr.bf16.mxu1 %v942_v60 }
 0x170   : > { %v865_v3 = vpack.c.bf16 %v775_v1, %v423_v2 }
 0x172   : > { %v778_v4 = vpop.f32.mrb[4].mxu0  ;;  %866 = vmatpush3.bf16.msra.mxu1 %v865_v3 }
 0x173   : > { %v433_v5 = vpop.f32.mrb[5].mxu0  ;;  %867 = vmatprep.subr.bf16.mxu1 %v942_v60 }
 0x174   : > { %v868_v6 = vpack.c.bf16 %v778_v4, %v433_v5 }
 0x176   : > { %v781_v7 = vpop.f32.mrb[6].mxu0  ;;  %869 = vmatpush3.bf16.msra.mxu1 %v868_v6 }
 0x177   : > { %v443_v8 = vpop.f32.mrb[7].mxu0  ;;  %870 = vmatprep.subr.bf16.mxu1 %v942_v60 }
 0x178   : > { %v871_v9 = vpack.c.bf16 %v781_v7, %v443_v8 }
 0x17a   : > { %v784_v10 = vpop.f32.mrb[8].mxu0  ;;  %872 = vmatpush3.bf16.msra.mxu1 %v871_v9 }
 0x17b   : > { %v453_v11 = vpop.f32.mrb[9].mxu0  ;;  %873 = vmatprep.subr.bf16.mxu1 %v942_v60 }
 0x17c   : > { %v874_v12 = vpack.c.bf16 %v784_v10, %v453_v11 }
 0x17e   : > { %v787_v13 = vpop.f32.mrb[10].mxu0  ;;  %875 = vmatpush3.bf16.msra.mxu1 %v874_v12 }
 0x17f   : > { %v463_v14 = vpop.f32.mrb[11].mxu0  ;;  %876 = vmatprep.subr.bf16.mxu1 %v942_v60 }
 0x180   : > { %v877_v15 = vpack.c.bf16 %v787_v13, %v463_v14 }
 0x182   : > { %v790_v16 = vpop.f32.mrb[12].mxu0  ;;  %878 = vmatpush3.bf16.msra.mxu1 %v877_v15 }
 0x183   : > { %v473_v17 = vpop.f32.mrb[13].mxu0  ;;  %879 = vmatprep.subr.bf16.mxu1 %v942_v60 }
 0x184   : > { %v880_v18 = vpack.c.bf16 %v790_v16, %v473_v17 }
 0x186   : > { %v793_v19 = vpop.f32.mrb[14].mxu0  ;;  %881 = vmatpush3.bf16.msra.mxu1 %v880_v18 }
 0x187   : > { %v483_v21 = vpop.f32.mrb[15].mxu0  ;;  %882 = vmatprep.subr.bf16.mxu1 %v942_v60 }
 0x188   : > { %v883_v23 = vpack.c.bf16 %v793_v19, %v483_v21 }
 0x18a   : > { %884 = vmatpush3.bf16.msra.mxu1 %v883_v23 }
 0x18d   : > { %827 = vmatmul.mubr.msk.f32.vlgmr.msra.gmra.mrb[0].mxu1 %vm498_vm1, %v941_v45 }
 0x260   : > { %v568_v24 = vpop.f32.mrb[0].mxu1 }
 0x261   : > { %v828_v25 = vpop.f32.mrb[1].mxu1  ;;  %573 = vst [vmem:[%s210_s9] sm:$0xff] %v568_v24 }
 0x262 PF: > { %s13_s14 = sadd.s32 1, %s938_s14   ;;  %s1095_s12 = smov %s934_s13 }
 0x263   : > { %p10_p6 = scmp.ge.s32.totalorder %s13_s14, 4   ;;  %s1096_s13 = smov %s1098_s15 }
 0x265   :  { %12 = sbr.rel (!%p10_p6) target bundleno = 2 (0x2), region = 69 }

</bundles_post_ra>
